<compile_context>
chip_gen: v5e
topology: v5e:2x2
jax: 0.10.0
libtpu: 0.0.40
codegen_flags: <defaults>
</compile_context>

<pallas_src>
import math
from functools import partial

import jax
import jax.numpy as jnp
from jax.experimental import pallas as pl
from jax.experimental.pallas import tpu as pltpu


# ---------------------------------------------------------------------------
# helpers
# ---------------------------------------------------------------------------
def _round_up(x, m):
    return ((x + m - 1) // m) * m


def _choose_tile(dim, cap, align):
    """Returns (tile, padded_dim) with tile | padded_dim and tile <= cap."""
    padded = _round_up(dim, align)
    if padded <= cap:
        return padded, padded
    return cap, _round_up(padded, cap)


_VMEM_LIMIT_CACHE = None


def _vmem_limit():
    """Generation-aware scoped-VMEM budget (~85% of physical per-core VMEM)."""
    global _VMEM_LIMIT_CACHE
    if _VMEM_LIMIT_CACHE is None:
        cap = 64 * 1024 * 1024  # conservative fallback (v7x per-core VMEM)
        try:
            info = pltpu.get_tpu_info()
            cap = int(getattr(info, "vmem_capacity_bytes", cap))
        except Exception:
            pass
        _VMEM_LIMIT_CACHE = int(max(cap, 16 * 1024 * 1024) * 0.85)
    return _VMEM_LIMIT_CACHE


# ---------------------------------------------------------------------------
# Tiled linear kernel:  y = x @ w + b     grid = (M/tm, N/tn, K/tk)
# ---------------------------------------------------------------------------
def _linear_kernel(x_ref, w_ref, b_ref, o_ref, acc_ref):
    @pl.when(pl.program_id(2) == 0)
    def _init():
        acc_ref[...] = jnp.zeros_like(acc_ref)

    acc_ref[...] += jnp.dot(x_ref[...], w_ref[...],
                            preferred_element_type=jnp.float32)

    @pl.when(pl.program_id(2) == pl.num_programs(2) - 1)
    def _finalize():
        o_ref[...] = (acc_ref[...] + b_ref[...].astype(jnp.float32)
                      ).astype(o_ref.dtype)


def linear(x2d, w, b):
    """x2d: (M, d_in); w: (d_in, d_out) (pre-transposed vs torch); b: (d_out,)."""
    M, d_in = x2d.shape
    d_out = w.shape[1]
    dtype = x2d.dtype

    tm, m_pad = _choose_tile(M, 256, 8)
    tk, k_pad = _choose_tile(d_in, 2048, 128)
    tn, n_pad = _choose_tile(d_out, 512, 128)

    if m_pad != M or k_pad != d_in:
        x2d = jnp.pad(x2d, ((0, m_pad - M), (0, k_pad - d_in)))
    if k_pad != d_in or n_pad != d_out:
        w = jnp.pad(w, ((0, k_pad - d_in), (0, n_pad - d_out)))
    if n_pad != d_out:
        b = jnp.pad(b, (0, n_pad - d_out))
    b2d = b.reshape(1, n_pad)

    out = pl.pallas_call(
        _linear_kernel,
        out_shape=jax.ShapeDtypeStruct((m_pad, n_pad), dtype),
        grid_spec=pltpu.PrefetchScalarGridSpec(
            num_scalar_prefetch=0,
            grid=(m_pad // tm, n_pad // tn, k_pad // tk),
            in_specs=[
                pl.BlockSpec((tm, tk), lambda i, j, k: (i, k)),   # x row/K tile
                pl.BlockSpec((tk, tn), lambda i, j, k: (k, j)),   # weight slab
                pl.BlockSpec((1, tn), lambda i, j, k: (0, j)),    # bias slab
            ],
            out_specs=pl.BlockSpec((tm, tn), lambda i, j, k: (i, j)),
            scratch_shapes=[pltpu.VMEM((tm, tn), jnp.float32)],
        ),
        compiler_params=pltpu.CompilerParams(
            dimension_semantics=("parallel", "parallel", "arbitrary"),
            vmem_limit_bytes=_vmem_limit(),
        ),
    )(x2d, w, b2d)

    if m_pad != M or n_pad != d_out:
        out = out[:M, :d_out]
    return out


# ---------------------------------------------------------------------------
# Attention core: one batch per grid step, all heads in-kernel,
# merged-heads lane-dense (1, Sq, d_model) output block.
# ---------------------------------------------------------------------------
def _attn_body(q, k, v, o_ref, h, scale, mask0):
    # q: (Sq, d_model); k, v: (Sk, d_model); mask0: (Sq, Sk) bool (True = masked) or None
    d_model = q.shape[-1]
    d_k = d_model // h

    q = q * scale          # scale once on (Sq, d_model) instead of per (Sq, Sk)
    kt = k.T               # one XLU transpose per batch -> pre-transposed K for all heads

    outs = []
    for i in range(h):     # static unroll over heads
        lo = i * d_k
        q_h = q[:, lo:lo + d_k]
        kt_h = kt[lo:lo + d_k, :]
        v_h = v[:, lo:lo + d_k]

        s = jnp.dot(q_h, kt_h, preferred_element_type=jnp.float32)   # (Sq, Sk) f32
        if mask0 is not None:
            s = jnp.where(mask0, -1e9, s)       # torch masked_fill(mask==0, -1e9)
        s = s - jnp.max(s, axis=-1, keepdims=True)
        p = jnp.exp(s)
        l = jnp.sum(p, axis=-1, keepdims=True)
        o_h = jnp.dot(p.astype(v.dtype), v_h, preferred_element_type=jnp.float32)
        # normalize the (Sq, d_k) output (fewer elements than (Sq, Sk)); EUP reciprocal
        outs.append(o_h * pl.reciprocal(l, approx=True))

    # single lane-dense store of the merged heads (last dim = d_model >= 128)
    o_ref[0] = jnp.concatenate(outs, axis=-1).astype(o_ref.dtype)


def _attn_kernel(q_ref, k_ref, v_ref, o_ref, *, h, scale):
    _attn_body(q_ref[0], k_ref[0], v_ref[0], o_ref, h, scale, None)


def _attn_kernel_masked(q_ref, k_ref, v_ref, m_ref, o_ref, *, h, scale):
    _attn_body(q_ref[0], k_ref[0], v_ref[0], o_ref, h, scale, m_ref[0] == 0)


def _attention(q_src, k_src, v_src, q_blk, k_blk, v_blk, mask, *, h, d_model):
    """q_src/k_src/v_src may be the same fused (B, S, n*d_model) array; the
    *_blk ints pick the d_model-wide column slab via the BlockSpec index_map."""
    B, Sq = q_src.shape[0], q_src.shape[1]
    Sk = k_src.shape[1]
    d_k = d_model // h
    scale = 1.0 / math.sqrt(d_k)

    q_spec = pl.BlockSpec((1, Sq, d_model), lambda b: (b, 0, q_blk))
    k_spec = pl.BlockSpec((1, Sk, d_model), lambda b: (b, 0, k_blk))
    v_spec = pl.BlockSpec((1, Sk, d_model), lambda b: (b, 0, v_blk))
    out_spec = pl.BlockSpec((1, Sq, d_model), lambda b: (b, 0, 0))

    if mask is None:
        kernel = partial(_attn_kernel, h=h, scale=scale)
        in_specs = [q_spec, k_spec, v_spec]
        args = (q_src, k_src, v_src)
    else:
        # mask stays (1-or-B, Sq, Sk) in HBM; batch-broadcast handled by index_map
        if mask.shape[0] == 1:
            m_spec = pl.BlockSpec((1, Sq, Sk), lambda b: (0, 0, 0))
        else:
            m_spec = pl.BlockSpec((1, Sq, Sk), lambda b: (b, 0, 0))
        kernel = partial(_attn_kernel_masked, h=h, scale=scale)
        in_specs = [q_spec, k_spec, v_spec, m_spec]
        args = (q_src, k_src, v_src, mask)

    return pl.pallas_call(
        kernel,
        out_shape=jax.ShapeDtypeStruct((B, Sq, d_model), q_src.dtype),
        grid_spec=pltpu.PrefetchScalarGridSpec(
            num_scalar_prefetch=0,
            grid=(B,),
            in_specs=in_specs,
            out_specs=out_spec,
        ),
        compiler_params=pltpu.CompilerParams(
            dimension_semantics=("parallel",),
            vmem_limit_bytes=_vmem_limit(),
        ),
    )(*args)


# ---------------------------------------------------------------------------
# Mask normalization (torch forward does mask.unsqueeze(1) -> broadcast heads)
# ---------------------------------------------------------------------------
def _normalize_mask(mask, sq, sk):
    if mask is None:
        return None
    if mask.ndim == 2:            # (Sq, Sk)
        mask = mask[None]
    elif mask.ndim == 4:          # (B|1, 1, Sq, Sk) torch-style
        mask = mask[:, 0]
    bm = mask.shape[0]
    # broadcast only the query/key dims (e.g. (B, 1, Sk) padding masks);
    # the batch dim is left un-broadcast and handled by the BlockSpec index_map.
    mask = jnp.broadcast_to(mask, (bm, sq, sk))
    return mask.astype(jnp.int32)


# ---------------------------------------------------------------------------
# MultiHeadedAttention forward (three projection-fusion variants)
# ---------------------------------------------------------------------------
@partial(jax.jit, static_argnames=("h",))
def _mha_fused_qkv(x, params, mask, *, h):
    wq, bq, wk, bk, wv, bv, wo, bo = params
    B, S, d_model = x.shape
    # Fused QKV: x streamed from HBM once, 3x MXU work per x tile.
    # TODO(synk): a real model would store the concatenated weight once.
    wqkv = jnp.concatenate([wq, wk, wv], axis=1)
    bqkv = jnp.concatenate([bq, bk, bv], axis=0)
    qkv = linear(x.reshape(B * S, d_model), wqkv, bqkv).reshape(B, S, 3 * d_model)
    mask = _normalize_mask(mask, S, S)
    attn = _attention(qkv, qkv, qkv, 0, 1, 2, mask, h=h, d_model=d_model)
    out = linear(attn.reshape(B * S, d_model), wo, bo)
    return out.reshape(B, S, d_model)


@partial(jax.jit, static_argnames=("h",))
def _mha_fused_kv(query, key, params, mask, *, h):
    wq, bq, wk, bk, wv, bv, wo, bo = params
    B, Sq, d_model = query.shape
    Sk = key.shape[1]
    q = linear(query.reshape(B * Sq, d_model), wq, bq).reshape(B, Sq, d_model)
    wkv = jnp.concatenate([wk, wv], axis=1)
    bkv = jnp.concatenate([bk, bv], axis=0)
    kv = linear(key.reshape(B * Sk, d_model), wkv, bkv).reshape(B, Sk, 2 * d_model)
    mask = _normalize_mask(mask, Sq, Sk)
    attn = _attention(q, kv, kv, 0, 0, 1, mask, h=h, d_model=d_model)
    out = linear(attn.reshape(B * Sq, d_model), wo, bo)
    return out.reshape(B, Sq, d_model)


@partial(jax.jit, static_argnames=("h",))
def _mha_separate(query, key, value, params, mask, *, h):
    wq, bq, wk, bk, wv, bv, wo, bo = params
    B, Sq, d_model = query.shape
    Sk = key.shape[1]
    q = linear(query.reshape(B * Sq, d_model), wq, bq).reshape(B, Sq, d_model)
    k = linear(key.reshape(B * Sk, d_model), wk, bk).reshape(B, Sk, d_model)
    v = linear(value.reshape(B * Sk, d_model), wv, bv).reshape(B, Sk, d_model)
    mask = _normalize_mask(mask, Sq, Sk)
    attn = _attention(q, k, v, 0, 0, 0, mask, h=h, d_model=d_model)
    out = linear(attn.reshape(B * Sq, d_model), wo, bo)
    return out.reshape(B, Sq, d_model)


def multi_headed_attention(query, key, value, params, mask=None, *, h):
    d_model = query.shape[-1]
    assert d_model % h == 0
    # column-slab BlockSpec slicing of a fused projection needs d_model % 128 == 0
    fusable = (d_model % 128 == 0)
    if fusable and (query is key) and (key is value):
        return _mha_fused_qkv(query, params, mask, h=h)
    if fusable and (key is value):
        return _mha_fused_kv(query, key, params, mask, h=h)
    return _mha_separate(query, key, value, params, mask, h=h)


# ---------------------------------------------------------------------------
# Params / reference / test
# ---------------------------------------------------------------------------
def init_params(key, d_model, dtype=jnp.float32):
    """torch.nn.Linear-style init, weights stored as (in, out)."""
    keys = jax.random.split(key, 8)
    lim = 1.0 / math.sqrt(d_model)

    def lin(kw, kb):
        w = jax.random.uniform(kw, (d_model, d_model), dtype, -lim, lim)
        b = jax.random.uniform(kb, (d_model,), dtype, -lim, lim)
        return w, b

    wq, bq = lin(keys[0], keys[1])
    wk, bk = lin(keys[2], keys[3])
    wv, bv = lin(keys[4], keys[5])
    wo, bo = lin(keys[6], keys[7])
    return (wq, bq, wk, bk, wv, bv, wo, bo)


def reference_mha(query, key, value, params, *, h, mask=None):
    wq, bq, wk, bk, wv, bv, wo, bo = params
    B, Sq, d_model = query.shape
    Sk = key.shape[1]
    d_k = d_model // h
    q = (query @ wq + bq).reshape(B, Sq, h, d_k).transpose(0, 2, 1, 3)
    k = (key @ wk + bk).reshape(B, Sk, h, d_k).transpose(0, 2, 1, 3)
    v = (value @ wv + bv).reshape(B, Sk, h, d_k).transpose(0, 2, 1, 3)
    scores = jnp.einsum("bhqd,bhkd->bhqk", q, k) / math.sqrt(d_k)
    if mask is not None:
        m = jnp.broadcast_to(mask.reshape(mask.shape[0], 1, Sq, Sk), (B, 1, Sq, Sk))
        scores = jnp.where(m == 0, -1e9, scores)
    p = jax.nn.softmax(scores, axis=-1)
    x = jnp.einsum("bhqk,bhkd->bhqd", p, v)
    x = x.transpose(0, 2, 1, 3).reshape(B, Sq, d_model)
    return x @ wo + bo


if __name__ == "__main__":
    B, S, h, d_model = 2, 8, 4, 128  # d_k = 32

    root = jax.random.PRNGKey(0)
    kx, km, kp = jax.random.split(root, 3)
    x = jax.random.normal(kx, (B, S, d_model), jnp.float32)
    params = init_params(kp, d_model)

    # causal mask (1 = keep, 0 = masked), batch-broadcast like the torch usage
    causal = jnp.tril(jnp.ones((S, S), jnp.int32))[None]   # (1, S, S)

    # 1) self-attention (query is key is value -> fused QKV path) with causal mask
    out = jax.block_until_ready(multi_headed_attention(x, x, x, params, causal, h=h))
    ref = reference_mha(x, x, x, params, h=h, mask=causal)
    assert out.shape == (B, S, d_model)
    assert jnp.allclose(out, ref, atol=2e-2, rtol=2e-2)

    # 2) self-attention, no mask
    out2 = jax.block_until_ready(multi_headed_attention(x, x, x, params, None, h=h))
    ref2 = reference_mha(x, x, x, params, h=h, mask=None)
    assert jnp.allclose(out2, ref2, atol=2e-2, rtol=2e-2)

    # 3) cross-attention: key is value (shared memory tensor, longer sequence)
    Sm = 16
    mem = jax.random.normal(km, (B, Sm, d_model), jnp.float32)
    out3 = jax.block_until_ready(multi_headed_attention(x, mem, mem, params, None, h=h))
    ref3 = reference_mha(x, mem, mem, params, h=h, mask=None)
    assert jnp.allclose(out3, ref3, atol=2e-2, rtol=2e-2)

    # 4) fully distinct query/key/value tensors -> separate projection path
    val = mem * 0.5 + 1.0
    out4 = jax.block_until_ready(multi_headed_attention(x, mem, val, params, None, h=h))
    ref4 = reference_mha(x, mem, val, params, h=h, mask=None)
    assert jnp.allclose(out4, ref4, atol=2e-2, rtol=2e-2)

    print("KERNEL_OK")
</pallas_src>

<mosaic_0001>
module attributes {stable_mosaic.version = 11 : i64} {
  func.func @_linear_kernel(%arg0: i32, %arg1: i32, %arg2: i32, %arg3: memref<16x128xf32, #tpu.memory_space<vmem>>, %arg4: memref<128x384xf32, #tpu.memory_space<vmem>>, %arg5: memref<1x384xf32, #tpu.memory_space<vmem>>, %arg6: memref<16x384xf32, #tpu.memory_space<vmem>>, %arg7: memref<16x384xf32, #tpu.memory_space<vmem>>) attributes {dimension_semantics = [#tpu.dimension_semantics<parallel>, #tpu.dimension_semantics<parallel>, #tpu.dimension_semantics<arbitrary>], iteration_bounds = array<i64: 1, 1, 1>, scalar_prefetch = 0 : i64, scratch_operands = 1 : i64, tpu.core_type = #tpu.core_type<tc>, window_params = [{transform_indices = @transform_0, window_bounds = array<i64: 16, 128>}, {transform_indices = @transform_1, window_bounds = array<i64: 128, 384>}, {transform_indices = @transform_2, window_bounds = array<i64: 1, 384>}, {transform_indices = @transform_3, window_bounds = array<i64: 16, 384>}]} {
    %c0_i32 = arith.constant 0 : i32
    %0 = arith.cmpi eq, %arg2, %c0_i32 : i32
    %1 = arith.extui %0 : i1 to i32
    %c0_i32_0 = arith.constant 0 : i32
    %2 = arith.cmpi ne, %1, %c0_i32_0 : i32
    scf.if %2 {
      %cst_10 = arith.constant 0.000000e+00 : f32
      %12 = vector.broadcast %cst_10 : f32 to vector<16x384xf32>
      %c0_11 = arith.constant 0 : index
      %c0_12 = arith.constant 0 : index
      %13 = vector.load %arg7[%c0_11, %c0_12] : memref<16x384xf32, #tpu.memory_space<vmem>>, vector<16x384xf32>
      tpu.vector_store %arg7[%c0_11, %c0_12], %12 {strides = array<i32>} : memref<16x384xf32, #tpu.memory_space<vmem>>, vector<16x384xf32>,
    } else {
    }
    %c0 = arith.constant 0 : index
    %c0_1 = arith.constant 0 : index
    %3 = vector.load %arg7[%c0, %c0_1] : memref<16x384xf32, #tpu.memory_space<vmem>>, vector<16x384xf32>
    %c0_2 = arith.constant 0 : index
    %c0_3 = arith.constant 0 : index
    %4 = vector.load %arg3[%c0_2, %c0_3] : memref<16x128xf32, #tpu.memory_space<vmem>>, vector<16x128xf32>
    %c0_4 = arith.constant 0 : index
    %c0_5 = arith.constant 0 : index
    %5 = vector.load %arg4[%c0_4, %c0_5] : memref<128x384xf32, #tpu.memory_space<vmem>>, vector<128x384xf32>
    %cst = arith.constant dense<0.000000e+00> : vector<16x384xf32>
    %6 = tpu.matmul %4, %5, %cst {dimension_numbers = #tpu.dot_dimension_numbers<[1], [0], [0], [1], [0, 0, 1, 1], [], []>} : vector<16x128xf32>, vector<128x384xf32>, vector<16x384xf32> -> vector<16x384xf32>
    %7 = arith.addf %3, %6 : vector<16x384xf32>
    %c0_6 = arith.constant 0 : index
    %c0_7 = arith.constant 0 : index
    %8 = vector.load %arg7[%c0_6, %c0_7] : memref<16x384xf32, #tpu.memory_space<vmem>>, vector<16x384xf32>
    tpu.vector_store %arg7[%c0_6, %c0_7], %7 {strides = array<i32>} : memref<16x384xf32, #tpu.memory_space<vmem>>, vector<16x384xf32>,
    %c0_i32_8 = arith.constant 0 : i32
    %9 = arith.cmpi eq, %arg2, %c0_i32_8 : i32
    %10 = arith.extui %9 : i1 to i32
    %c0_i32_9 = arith.constant 0 : i32
    %11 = arith.cmpi ne, %10, %c0_i32_9 : i32
    scf.if %11 {
      %c0_10 = arith.constant 0 : index
      %c0_11 = arith.constant 0 : index
      %12 = vector.load %arg7[%c0_10, %c0_11] : memref<16x384xf32, #tpu.memory_space<vmem>>, vector<16x384xf32>
      %c0_12 = arith.constant 0 : index
      %c0_13 = arith.constant 0 : index
      %13 = vector.load %arg5[%c0_12, %c0_13] : memref<1x384xf32, #tpu.memory_space<vmem>>, vector<1x384xf32>
      %14 = vector.broadcast %13 : vector<1x384xf32> to vector<16x384xf32>
      %15 = arith.addf %12, %14 : vector<16x384xf32>
      %c0_14 = arith.constant 0 : index
      %c0_15 = arith.constant 0 : index
      %16 = vector.load %arg6[%c0_14, %c0_15] : memref<16x384xf32, #tpu.memory_space<vmem>>, vector<16x384xf32>
      tpu.vector_store %arg6[%c0_14, %c0_15], %15 {strides = array<i32>} : memref<16x384xf32, #tpu.memory_space<vmem>>, vector<16x384xf32>,
    } else {
    }
    return
  }
  func.func @transform_0(%arg0: i32, %arg1: i32, %arg2: i32) -> (i32, i32) {
    %c0_i32 = arith.constant 0 : i32
    return %arg0, %arg2 : i32, i32
  }
  func.func @transform_1(%arg0: i32, %arg1: i32, %arg2: i32) -> (i32, i32) {
    %c0_i32 = arith.constant 0 : i32
    return %arg2, %arg1 : i32, i32
  }
  func.func @transform_2(%arg0: i32, %arg1: i32, %arg2: i32) -> (i32, i32) {
    %c0_i32 = arith.constant 0 : i32
    %c0_i32_0 = arith.constant 0 : i32
    return %c0_i32, %arg1 : i32, i32
  }
  func.func @transform_3(%arg0: i32, %arg1: i32, %arg2: i32) -> (i32, i32) {
    %c0_i32 = arith.constant 0 : i32
    return %arg0, %arg1 : i32, i32
  }
}

module attributes {stable_mosaic.version = 11 : i64} {
  func.func @_linear_kernel(%arg0: i32, %arg1: i32, %arg2: i32, %arg3: memref<16x128xf32, #tpu.memory_space<vmem>>, %arg4: memref<128x128xf32, #tpu.memory_space<vmem>>, %arg5: memref<1x128xf32, #tpu.memory_space<vmem>>, %arg6: memref<16x128xf32, #tpu.memory_space<vmem>>, %arg7: memref<16x128xf32, #tpu.memory_space<vmem>>) attributes {dimension_semantics = [#tpu.dimension_semantics<parallel>, #tpu.dimension_semantics<parallel>, #tpu.dimension_semantics<arbitrary>], iteration_bounds = array<i64: 1, 1, 1>, scalar_prefetch = 0 : i64, scratch_operands = 1 : i64, tpu.core_type = #tpu.core_type<tc>, window_params = [{transform_indices = @transform_0, window_bounds = array<i64: 16, 128>}, {transform_indices = @transform_1, window_bounds = array<i64: 128, 128>}, {transform_indices = @transform_2, window_bounds = array<i64: 1, 128>}, {transform_indices = @transform_3, window_bounds = array<i64: 16, 128>}]} {
    %c0_i32 = arith.constant 0 : i32
    %0 = arith.cmpi eq, %arg2, %c0_i32 : i32
    %1 = arith.extui %0 : i1 to i32
    %c0_i32_0 = arith.constant 0 : i32
    %2 = arith.cmpi ne, %1, %c0_i32_0 : i32
    scf.if %2 {
      %cst_10 = arith.constant 0.000000e+00 : f32
      %12 = vector.broadcast %cst_10 : f32 to vector<16x128xf32>
      %c0_11 = arith.constant 0 : index
      %c0_12 = arith.constant 0 : index
      %13 = vector.load %arg7[%c0_11, %c0_12] : memref<16x128xf32, #tpu.memory_space<vmem>>, vector<16x128xf32>
      tpu.vector_store %arg7[%c0_11, %c0_12], %12 {strides = array<i32>} : memref<16x128xf32, #tpu.memory_space<vmem>>, vector<16x128xf32>,
    } else {
    }
    %c0 = arith.constant 0 : index
    %c0_1 = arith.constant 0 : index
    %3 = vector.load %arg7[%c0, %c0_1] : memref<16x128xf32, #tpu.memory_space<vmem>>, vector<16x128xf32>
    %c0_2 = arith.constant 0 : index
    %c0_3 = arith.constant 0 : index
    %4 = vector.load %arg3[%c0_2, %c0_3] : memref<16x128xf32, #tpu.memory_space<vmem>>, vector<16x128xf32>
    %c0_4 = arith.constant 0 : index
    %c0_5 = arith.constant 0 : index
    %5 = vector.load %arg4[%c0_4, %c0_5] : memref<128x128xf32, #tpu.memory_space<vmem>>, vector<128x128xf32>
    %cst = arith.constant dense<0.000000e+00> : vector<16x128xf32>
    %6 = tpu.matmul %4, %5, %cst {dimension_numbers = #tpu.dot_dimension_numbers<[1], [0], [0], [1], [0, 0, 1, 1], [], []>} : vector<16x128xf32>, vector<128x128xf32>, vector<16x128xf32> -> vector<16x128xf32>
    %7 = arith.addf %3, %6 : vector<16x128xf32>
    %c0_6 = arith.constant 0 : index
    %c0_7 = arith.constant 0 : index
    %8 = vector.load %arg7[%c0_6, %c0_7] : memref<16x128xf32, #tpu.memory_space<vmem>>, vector<16x128xf32>
    tpu.vector_store %arg7[%c0_6, %c0_7], %7 {strides = array<i32>} : memref<16x128xf32, #tpu.memory_space<vmem>>, vector<16x128xf32>,
    %c0_i32_8 = arith.constant 0 : i32
    %9 = arith.cmpi eq, %arg2, %c0_i32_8 : i32
    %10 = arith.extui %9 : i1 to i32
    %c0_i32_9 = arith.constant 0 : i32
    %11 = arith.cmpi ne, %10, %c0_i32_9 : i32
    scf.if %11 {
      %c0_10 = arith.constant 0 : index
      %c0_11 = arith.constant 0 : index
      %12 = vector.load %arg7[%c0_10, %c0_11] : memref<16x128xf32, #tpu.memory_space<vmem>>, vector<16x128xf32>
      %c0_12 = arith.constant 0 : index
      %c0_13 = arith.constant 0 : index
      %13 = vector.load %arg5[%c0_12, %c0_13] : memref<1x128xf32, #tpu.memory_space<vmem>>, vector<1x128xf32>
      %14 = vector.broadcast %13 : vector<1x128xf32> to vector<16x128xf32>
      %15 = arith.addf %12, %14 : vector<16x128xf32>
      %c0_14 = arith.constant 0 : index
      %c0_15 = arith.constant 0 : index
      %16 = vector.load %arg6[%c0_14, %c0_15] : memref<16x128xf32, #tpu.memory_space<vmem>>, vector<16x128xf32>
      tpu.vector_store %arg6[%c0_14, %c0_15], %15 {strides = array<i32>} : memref<16x128xf32, #tpu.memory_space<vmem>>, vector<16x128xf32>,
    } else {
    }
    return
  }
  func.func @transform_0(%arg0: i32, %arg1: i32, %arg2: i32) -> (i32, i32) {
    %c0_i32 = arith.constant 0 : i32
    return %arg0, %arg2 : i32, i32
  }
  func.func @transform_1(%arg0: i32, %arg1: i32, %arg2: i32) -> (i32, i32) {
    %c0_i32 = arith.constant 0 : i32
    return %arg2, %arg1 : i32, i32
  }
  func.func @transform_2(%arg0: i32, %arg1: i32, %arg2: i32) -> (i32, i32) {
    %c0_i32 = arith.constant 0 : i32
    %c0_i32_0 = arith.constant 0 : i32
    return %c0_i32, %arg1 : i32, i32
  }
  func.func @transform_3(%arg0: i32, %arg1: i32, %arg2: i32) -> (i32, i32) {
    %c0_i32 = arith.constant 0 : i32
    return %arg0, %arg1 : i32, i32
  }
}

module attributes {stable_mosaic.version = 11 : i64} {
  func.func @_attn_kernel_masked(%arg0: i32, %arg1: memref<1x8x128xf32, #tpu.memory_space<vmem>>, %arg2: memref<1x8x128xf32, #tpu.memory_space<vmem>>, %arg3: memref<1x8x128xf32, #tpu.memory_space<vmem>>, %arg4: memref<1x8x8xi32, #tpu.memory_space<vmem>>, %arg5: memref<1x8x128xf32, #tpu.memory_space<vmem>>) attributes {dimension_semantics = [#tpu.dimension_semantics<parallel>], iteration_bounds = array<i64: 2>, scalar_prefetch = 0 : i64, scratch_operands = 0 : i64, tpu.core_type = #tpu.core_type<tc>, window_params = [{transform_indices = @transform_0, window_bounds = array<i64: 1, 8, 128>}, {transform_indices = @transform_1, window_bounds = array<i64: 1, 8, 128>}, {transform_indices = @transform_2, window_bounds = array<i64: 1, 8, 128>}, {pipeline_mode = #tpu.pipeline_mode<synchronous>, transform_indices = @transform_3, window_bounds = array<i64: 1, 8, 8>}, {transform_indices = @transform_4, window_bounds = array<i64: 1, 8, 128>}]} {
    %c0 = arith.constant 0 : index
    %c0_0 = arith.constant 0 : index
    %c0_1 = arith.constant 0 : index
    %0 = vector.load %arg1[%c0, %c0_0, %c0_1] : memref<1x8x128xf32, #tpu.memory_space<vmem>>, vector<1x8x128xf32>
    %1 = vector.shape_cast %0 : vector<1x8x128xf32> to vector<8x128xf32>
    %c0_2 = arith.constant 0 : index
    %c0_3 = arith.constant 0 : index
    %c0_4 = arith.constant 0 : index
    %2 = vector.load %arg2[%c0_2, %c0_3, %c0_4] : memref<1x8x128xf32, #tpu.memory_space<vmem>>, vector<1x8x128xf32>
    %3 = vector.shape_cast %2 : vector<1x8x128xf32> to vector<8x128xf32>
    %c0_5 = arith.constant 0 : index
    %c0_6 = arith.constant 0 : index
    %c0_7 = arith.constant 0 : index
    %4 = vector.load %arg3[%c0_5, %c0_6, %c0_7] : memref<1x8x128xf32, #tpu.memory_space<vmem>>, vector<1x8x128xf32>
    %5 = vector.shape_cast %4 : vector<1x8x128xf32> to vector<8x128xf32>
    %c0_8 = arith.constant 0 : index
    %c0_9 = arith.constant 0 : index
    %c0_10 = arith.constant 0 : index
    %6 = vector.load %arg4[%c0_8, %c0_9, %c0_10] : memref<1x8x8xi32, #tpu.memory_space<vmem>>, vector<1x8x8xi32>
    %7 = vector.shape_cast %6 : vector<1x8x8xi32> to vector<8x8xi32>
    %c0_i32 = arith.constant 0 : i32
    %8 = vector.broadcast %c0_i32 : i32 to vector<8x8xi32>
    %9 = arith.cmpi eq, %7, %8 : vector<8x8xi32>
    %cst = arith.constant 0.176776692 : f32
    %10 = vector.broadcast %cst : f32 to vector<8x128xf32>
    %11 = arith.mulf %1, %10 : vector<8x128xf32>
    %12 = tpu.transpose %3, [1, 0] : vector<8x128xf32> -> vector<128x8xf32>
    %13 = vector.extract_strided_slice %11 {offsets = [0, 0], sizes = [8, 32], strides = [1, 1]} : vector<8x128xf32> to vector<8x32xf32>
    %14 = vector.extract_strided_slice %12 {offsets = [0, 0], sizes = [32, 8], strides = [1, 1]} : vector<128x8xf32> to vector<32x8xf32>
    %15 = vector.extract_strided_slice %5 {offsets = [0, 0], sizes = [8, 32], strides = [1, 1]} : vector<8x128xf32> to vector<8x32xf32>
    %cst_11 = arith.constant dense<0.000000e+00> : vector<8x8xf32>
    %16 = tpu.matmul %13, %14, %cst_11 {dimension_numbers = #tpu.dot_dimension_numbers<[1], [0], [0], [1], [0, 0, 1, 1], [], []>} : vector<8x32xf32>, vector<32x8xf32>, vector<8x8xf32> -> vector<8x8xf32>
    %cst_12 = arith.constant -1.000000e+09 : f32
    %17 = vector.broadcast %cst_12 : f32 to vector<8x8xf32>
    %18 = arith.select %9, %17, %16 : vector<8x8xi1>, vector<8x8xf32>
    %cst_13 = arith.constant dense<0xFF800000> : vector<8xf32>
    %19 = vector.multi_reduction <maximumf>, %18, %cst_13 [1] : vector<8x8xf32> to vector<8xf32>
    %20 = vector.shape_cast %19 : vector<8xf32> to vector<8x1xf32>
    %21 = vector.broadcast %20 : vector<8x1xf32> to vector<8x8xf32>
    %22 = arith.subf %18, %21 : vector<8x8xf32>
    %23 = math.exp %22 : vector<8x8xf32>
    %cst_14 = arith.constant dense<0.000000e+00> : vector<8xf32>
    %24 = vector.multi_reduction <add>, %23, %cst_14 [1] : vector<8x8xf32> to vector<8xf32>
    %25 = vector.shape_cast %24 : vector<8xf32> to vector<8x1xf32>
    %cst_15 = arith.constant dense<0.000000e+00> : vector<8x32xf32>
    %26 = tpu.matmul %23, %15, %cst_15 {dimension_numbers = #tpu.dot_dimension_numbers<[1], [0], [0], [1], [0, 0, 1, 1], [], []>} : vector<8x8xf32>, vector<8x32xf32>, vector<8x32xf32> -> vector<8x32xf32>
    %27 = tpu.reciprocal %25 {approx = true} : vector<8x1xf32> -> vector<8x1xf32>
    %28 = vector.broadcast %27 : vector<8x1xf32> to vector<8x32xf32>
    %29 = arith.mulf %26, %28 : vector<8x32xf32>
    %30 = vector.extract_strided_slice %11 {offsets = [0, 32], sizes = [8, 32], strides = [1, 1]} : vector<8x128xf32> to vector<8x32xf32>
    %31 = vector.extract_strided_slice %12 {offsets = [32, 0], sizes = [32, 8], strides = [1, 1]} : vector<128x8xf32> to vector<32x8xf32>
    %32 = vector.extract_strided_slice %5 {offsets = [0, 32], sizes = [8, 32], strides = [1, 1]} : vector<8x128xf32> to vector<8x32xf32>
    %cst_16 = arith.constant dense<0.000000e+00> : vector<8x8xf32>
    %33 = tpu.matmul %30, %31, %cst_16 {dimension_numbers = #tpu.dot_dimension_numbers<[1], [0], [0], [1], [0, 0, 1, 1], [], []>} : vector<8x32xf32>, vector<32x8xf32>, vector<8x8xf32> -> vector<8x8xf32>
    %cst_17 = arith.constant -1.000000e+09 : f32
    %34 = vector.broadcast %cst_17 : f32 to vector<8x8xf32>
    %35 = arith.select %9, %34, %33 : vector<8x8xi1>, vector<8x8xf32>
    %cst_18 = arith.constant dense<0xFF800000> : vector<8xf32>
    %36 = vector.multi_reduction <maximumf>, %35, %cst_18 [1] : vector<8x8xf32> to vector<8xf32>
    %37 = vector.shape_cast %36 : vector<8xf32> to vector<8x1xf32>
    %38 = vector.broadcast %37 : vector<8x1xf32> to vector<8x8xf32>
    %39 = arith.subf %35, %38 : vector<8x8xf32>
    %40 = math.exp %39 : vector<8x8xf32>
    %cst_19 = arith.constant dense<0.000000e+00> : vector<8xf32>
    %41 = vector.multi_reduction <add>, %40, %cst_19 [1] : vector<8x8xf32> to vector<8xf32>
    %42 = vector.shape_cast %41 : vector<8xf32> to vector<8x1xf32>
    %cst_20 = arith.constant dense<0.000000e+00> : vector<8x32xf32>
    %43 = tpu.matmul %40, %32, %cst_20 {dimension_numbers = #tpu.dot_dimension_numbers<[1], [0], [0], [1], [0, 0, 1, 1], [], []>} : vector<8x8xf32>, vector<8x32xf32>, vector<8x32xf32> -> vector<8x32xf32>
    %44 = tpu.reciprocal %42 {approx = true} : vector<8x1xf32> -> vector<8x1xf32>
    %45 = vector.broadcast %44 : vector<8x1xf32> to vector<8x32xf32>
    %46 = arith.mulf %43, %45 : vector<8x32xf32>
    %47 = vector.extract_strided_slice %11 {offsets = [0, 64], sizes = [8, 32], strides = [1, 1]} : vector<8x128xf32> to vector<8x32xf32>
    %48 = vector.extract_strided_slice %12 {offsets = [64, 0], sizes = [32, 8], strides = [1, 1]} : vector<128x8xf32> to vector<32x8xf32>
    %49 = vector.extract_strided_slice %5 {offsets = [0, 64], sizes = [8, 32], strides = [1, 1]} : vector<8x128xf32> to vector<8x32xf32>
    %cst_21 = arith.constant dense<0.000000e+00> : vector<8x8xf32>
    %50 = tpu.matmul %47, %48, %cst_21 {dimension_numbers = #tpu.dot_dimension_numbers<[1], [0], [0], [1], [0, 0, 1, 1], [], []>} : vector<8x32xf32>, vector<32x8xf32>, vector<8x8xf32> -> vector<8x8xf32>
    %cst_22 = arith.constant -1.000000e+09 : f32
    %51 = vector.broadcast %cst_22 : f32 to vector<8x8xf32>
    %52 = arith.select %9, %51, %50 : vector<8x8xi1>, vector<8x8xf32>
    %cst_23 = arith.constant dense<0xFF800000> : vector<8xf32>
    %53 = vector.multi_reduction <maximumf>, %52, %cst_23 [1] : vector<8x8xf32> to vector<8xf32>
    %54 = vector.shape_cast %53 : vector<8xf32> to vector<8x1xf32>
    %55 = vector.broadcast %54 : vector<8x1xf32> to vector<8x8xf32>
    %56 = arith.subf %52, %55 : vector<8x8xf32>
    %57 = math.exp %56 : vector<8x8xf32>
    %cst_24 = arith.constant dense<0.000000e+00> : vector<8xf32>
    %58 = vector.multi_reduction <add>, %57, %cst_24 [1] : vector<8x8xf32> to vector<8xf32>
    %59 = vector.shape_cast %58 : vector<8xf32> to vector<8x1xf32>
    %cst_25 = arith.constant dense<0.000000e+00> : vector<8x32xf32>
    %60 = tpu.matmul %57, %49, %cst_25 {dimension_numbers = #tpu.dot_dimension_numbers<[1], [0], [0], [1], [0, 0, 1, 1], [], []>} : vector<8x8xf32>, vector<8x32xf32>, vector<8x32xf32> -> vector<8x32xf32>
    %61 = tpu.reciprocal %59 {approx = true} : vector<8x1xf32> -> vector<8x1xf32>
    %62 = vector.broadcast %61 : vector<8x1xf32> to vector<8x32xf32>
    %63 = arith.mulf %60, %62 : vector<8x32xf32>
    %64 = vector.extract_strided_slice %11 {offsets = [0, 96], sizes = [8, 32], strides = [1, 1]} : vector<8x128xf32> to vector<8x32xf32>
    %65 = vector.extract_strided_slice %12 {offsets = [96, 0], sizes = [32, 8], strides = [1, 1]} : vector<128x8xf32> to vector<32x8xf32>
    %66 = vector.extract_strided_slice %5 {offsets = [0, 96], sizes = [8, 32], strides = [1, 1]} : vector<8x128xf32> to vector<8x32xf32>
    %cst_26 = arith.constant dense<0.000000e+00> : vector<8x8xf32>
    %67 = tpu.matmul %64, %65, %cst_26 {dimension_numbers = #tpu.dot_dimension_numbers<[1], [0], [0], [1], [0, 0, 1, 1], [], []>} : vector<8x32xf32>, vector<32x8xf32>, vector<8x8xf32> -> vector<8x8xf32>
    %cst_27 = arith.constant -1.000000e+09 : f32
    %68 = vector.broadcast %cst_27 : f32 to vector<8x8xf32>
    %69 = arith.select %9, %68, %67 : vector<8x8xi1>, vector<8x8xf32>
    %cst_28 = arith.constant dense<0xFF800000> : vector<8xf32>
    %70 = vector.multi_reduction <maximumf>, %69, %cst_28 [1] : vector<8x8xf32> to vector<8xf32>
    %71 = vector.shape_cast %70 : vector<8xf32> to vector<8x1xf32>
    %72 = vector.broadcast %71 : vector<8x1xf32> to vector<8x8xf32>
    %73 = arith.subf %69, %72 : vector<8x8xf32>
    %74 = math.exp %73 : vector<8x8xf32>
    %cst_29 = arith.constant dense<0.000000e+00> : vector<8xf32>
    %75 = vector.multi_reduction <add>, %74, %cst_29 [1] : vector<8x8xf32> to vector<8xf32>
    %76 = vector.shape_cast %75 : vector<8xf32> to vector<8x1xf32>
    %cst_30 = arith.constant dense<0.000000e+00> : vector<8x32xf32>
    %77 = tpu.matmul %74, %66, %cst_30 {dimension_numbers = #tpu.dot_dimension_numbers<[1], [0], [0], [1], [0, 0, 1, 1], [], []>} : vector<8x8xf32>, vector<8x32xf32>, vector<8x32xf32> -> vector<8x32xf32>
    %78 = tpu.reciprocal %76 {approx = true} : vector<8x1xf32> -> vector<8x1xf32>
    %79 = vector.broadcast %78 : vector<8x1xf32> to vector<8x32xf32>
    %80 = arith.mulf %77, %79 : vector<8x32xf32>
    %81 = tpu.concatenate %29, %46, %63, %80 in 1 : vector<8x32xf32>, vector<8x32xf32>, vector<8x32xf32>, vector<8x32xf32> -> vector<8x128xf32>
    %c0_31 = arith.constant 0 : index
    %c0_32 = arith.constant 0 : index
    %c0_33 = arith.constant 0 : index
    %82 = vector.load %arg5[%c0_31, %c0_32, %c0_33] : memref<1x8x128xf32, #tpu.memory_space<vmem>>, vector<1x8x128xf32>
    %83 = vector.shape_cast %82 : vector<1x8x128xf32> to vector<8x128xf32>
    %84 = vector.shape_cast %81 : vector<8x128xf32> to vector<1x8x128xf32>
    tpu.vector_store %arg5[%c0_31, %c0_32, %c0_33], %84 {strides = array<i32>} : memref<1x8x128xf32, #tpu.memory_space<vmem>>, vector<1x8x128xf32>,
    return
  }
  func.func @transform_0(%arg0: i32) -> (i32, i32, i32) {
    %c0_i32 = arith.constant 0 : i32
    %c0_i32_0 = arith.constant 0 : i32
    %c0_i32_1 = arith.constant 0 : i32
    return %arg0, %c0_i32, %c0_i32_0 : i32, i32, i32
  }
  func.func @transform_1(%arg0: i32) -> (i32, i32, i32) {
    %c0_i32 = arith.constant 0 : i32
    %c1_i32 = arith.constant 1 : i32
    %c0_i32_0 = arith.constant 0 : i32
    return %arg0, %c0_i32, %c1_i32 : i32, i32, i32
  }
  func.func @transform_2(%arg0: i32) -> (i32, i32, i32) {
    %c0_i32 = arith.constant 0 : i32
    %c2_i32 = arith.constant 2 : i32
    %c0_i32_0 = arith.constant 0 : i32
    return %arg0, %c0_i32, %c2_i32 : i32, i32, i32
  }
  func.func @transform_3(%arg0: i32) -> (i32, i32, i32) {
    %c0_i32 = arith.constant 0 : i32
    %c0_i32_0 = arith.constant 0 : i32
    %c0_i32_1 = arith.constant 0 : i32
    %c0_i32_2 = arith.constant 0 : i32
    return %c0_i32, %c0_i32_0, %c0_i32_1 : i32, i32, i32
  }
  func.func @transform_4(%arg0: i32) -> (i32, i32, i32) {
    %c0_i32 = arith.constant 0 : i32
    %c0_i32_0 = arith.constant 0 : i32
    %c0_i32_1 = arith.constant 0 : i32
    return %arg0, %c0_i32, %c0_i32_0 : i32, i32, i32
  }
}

</mosaic_0001>

<bundles_post_ra>
// kernel: _mha_fused_qkv.3
= control target key start
LH: loop header
LB: loop body
LE: loop exit
PB: predicated region body
PF: predicated region fallthrough
CT: control target
= control target key end

     0   :  { %s401_s1 = inlined_call_operand.vmem [shape: f32[128,384], index: 1, kind: input, shape index: {}]   ;;  %s402_s0 = inlined_call_operand.vmem [shape: f32[16,128], index: 0, kind: input, shape index: {}]   ;;  %s403_s2 = inlined_call_operand.vmem [shape: f32[1,384], index: 2, kind: input, shape index: {}]   ;;  %s404_s3 = inlined_call_operand.vmem [shape: f32[16,384], index: 3, kind: output, shape index: {}]  }
   0x1   :  { %v79_v0 = vld [vmem:[%s401_s1 + $0x178] sm:$0xff]  ;;  %v76_v1 = vld [vmem:[%s401_s1 + $0x160] sm:$0xff]  ;;  %v78_v2 = vld [vmem:[%s401_s1 + $0x170] sm:$0xff] }
   0x2   :  { %126 = vmatpush.msra.mxu2 %v79_v0  ;;  %v77_v3 = vld [vmem:[%s401_s1 + $0x168] sm:$0xff]  ;;  %103 = vmatpush.msra.mxu1 %v78_v2  ;;  %v75_v5 = vld [vmem:[%s401_s1 + $0x158] sm:$0xff]  ;;  %v74_v6 = vld [vmem:[%s401_s1 + $0x150] sm:$0xff] }
   0x3   :  { %v73_v4 = vld [vmem:[%s401_s1 + $0x148] sm:$0xff]  ;;  %194 = vmatpush.msra.mxu3 %v77_v3  ;;  %v72_v7 = vld [vmem:[%s401_s1 + $0x140] sm:$0xff]  ;;  %v71_v8 = vld [vmem:[%s401_s1 + $0x138] sm:$0xff]  ;;  %80 = vmatpush.msra.mxu0 %v77_v3 }
   0x4   :  { %127 = vmatpush.msra.mxu2 %v76_v1  ;;  %v70_v9 = vld [vmem:[%s401_s1 + $0x130] sm:$0xff]  ;;  %104 = vmatpush.msra.mxu1 %v75_v5  ;;  %v69_v10 = vld [vmem:[%s401_s1 + $0x128] sm:$0xff]  ;;  %v68_v11 = vld [vmem:[%s401_s1 + $0x120] sm:$0xff] }
   0x5   :  { %195 = vmatpush.msra.mxu3 %v74_v6  ;;  %81 = vmatpush.msra.mxu0 %v74_v6  ;;  %v67_v12 = vld [vmem:[%s401_s1 + $0x118] sm:$0xff]  ;;  %v66_v13 = vld [vmem:[%s401_s1 + $0x110] sm:$0xff]  ;;  %v65_v14 = vld [vmem:[%s401_s1 + $0x108] sm:$0xff] }
   0x6   :  { %128 = vmatpush.msra.mxu2 %v73_v4  ;;  %105 = vmatpush.msra.mxu1 %v72_v7  ;;  %v64_v15 = vld [vmem:[%s401_s1 + $0x100] sm:$0xff]  ;;  %v63_v16 = vld [vmem:[%s401_s1 + $0xf8] sm:$0xff]  ;;  %v62_v17 = vld [vmem:[%s401_s1 + $0xf0] sm:$0xff] }
   0x7   :  { %196 = vmatpush.msra.mxu3 %v71_v8  ;;  %82 = vmatpush.msra.mxu0 %v71_v8  ;;  %v61_v18 = vld [vmem:[%s401_s1 + $0xe8] sm:$0xff]  ;;  %v60_v19 = vld [vmem:[%s401_s1 + $0xe0] sm:$0xff]  ;;  %v59_v20 = vld [vmem:[%s401_s1 + $0xd8] sm:$0xff] }
   0x8   :  { %129 = vmatpush.msra.mxu2 %v70_v9  ;;  %106 = vmatpush.msra.mxu1 %v69_v10  ;;  %v58_v21 = vld [vmem:[%s401_s1 + $0xd0] sm:$0xff]  ;;  %v57_v22 = vld [vmem:[%s401_s1 + $0xc8] sm:$0xff]  ;;  %v56_v23 = vld [vmem:[%s401_s1 + $0xc0] sm:$0xff] }
   0x9   :  { %197 = vmatpush.msra.mxu3 %v68_v11  ;;  %83 = vmatpush.msra.mxu0 %v68_v11  ;;  %v55_v24 = vld [vmem:[%s401_s1 + $0xb8] sm:$0xff]  ;;  %v54_v25 = vld [vmem:[%s401_s1 + $0xb0] sm:$0xff]  ;;  %v53_v26 = vld [vmem:[%s401_s1 + $0xa8] sm:$0xff] }
   0xa   :  { %130 = vmatpush.msra.mxu2 %v67_v12  ;;  %107 = vmatpush.msra.mxu1 %v66_v13  ;;  %v52_v27 = vld [vmem:[%s401_s1 + $0xa0] sm:$0xff]  ;;  %v51_v28 = vld [vmem:[%s401_s1 + $0x98] sm:$0xff]  ;;  %v50_v29 = vld [vmem:[%s401_s1 + $0x90] sm:$0xff] }
   0xb   :  { %198 = vmatpush.msra.mxu3 %v65_v14  ;;  %84 = vmatpush.msra.mxu0 %v65_v14  ;;  %v49_v30 = vld [vmem:[%s401_s1 + $0x88] sm:$0xff]  ;;  %v48_v31 = vld [vmem:[%s401_s1 + $0x80] sm:$0xff]  ;;  %v47_v32 = vld [vmem:[%s401_s1 + $0x78] sm:$0xff] }
   0xc   :  { %131 = vmatpush.msra.mxu2 %v64_v15  ;;  %108 = vmatpush.msra.mxu1 %v63_v16  ;;  %v46_v33 = vld [vmem:[%s401_s1 + $0x70] sm:$0xff]  ;;  %v45_v34 = vld [vmem:[%s401_s1 + $0x68] sm:$0xff]  ;;  %v44_v35 = vld [vmem:[%s401_s1 + $0x60] sm:$0xff] }
   0xd   :  { %199 = vmatpush.msra.mxu3 %v62_v17  ;;  %85 = vmatpush.msra.mxu0 %v62_v17  ;;  %v43_v36 = vld [vmem:[%s401_s1 + $0x58] sm:$0xff]  ;;  %v42_v37 = vld [vmem:[%s401_s1 + $0x50] sm:$0xff]  ;;  %v41_v38 = vld [vmem:[%s401_s1 + $0x48] sm:$0xff] }
   0xe   :  { %132 = vmatpush.msra.mxu2 %v61_v18  ;;  %109 = vmatpush.msra.mxu1 %v60_v19  ;;  %v40_v39 = vld [vmem:[%s401_s1 + $0x40] sm:$0xff]  ;;  %v39_v40 = vld [vmem:[%s401_s1 + $0x38] sm:$0xff]  ;;  %v38_v41 = vld [vmem:[%s401_s1 + $0x30] sm:$0xff] }
   0xf   :  { %200 = vmatpush.msra.mxu3 %v59_v20  ;;  %86 = vmatpush.msra.mxu0 %v59_v20  ;;  %v37_v42 = vld [vmem:[%s401_s1 + $0x28] sm:$0xff]  ;;  %v36_v43 = vld [vmem:[%s401_s1 + $0x20] sm:$0xff]  ;;  %v35_v44 = vld [vmem:[%s401_s1 + $0x18] sm:$0xff] }
  0x10   :  { %133 = vmatpush.msra.mxu2 %v58_v21  ;;  %110 = vmatpush.msra.mxu1 %v57_v22  ;;  %v34_v45 = vld [vmem:[%s401_s1 + $0x10] sm:$0xff]  ;;  %v30_v46 = vld [vmem:[%s402_s0] sm:$0xff]  ;;  %v33_v47 = vld [vmem:[%s401_s1 + $0x8] sm:$0xff] }
  0x11   :  { %201 = vmatpush.msra.mxu3 %v56_v23  ;;  %87 = vmatpush.msra.mxu0 %v56_v23  ;;  %v32_v48 = vld [vmem:[%s401_s1] sm:$0xff]  ;;  %v31_v49 = vld [vmem:[%s402_s0 + $0x8] sm:$0xff] }
  0x12   :  { %134 = vmatpush.msra.mxu2 %v55_v24  ;;  %111 = vmatpush.msra.mxu1 %v54_v25  ;;  %v170_v50 = vld [vmem:[%s403_s2] sm:$0x7] }
  0x13   :  { %202 = vmatpush.msra.mxu3 %v53_v26  ;;  %88 = vmatpush.msra.mxu0 %v53_v26  ;;  %v173_v51 = vperm.slane %v170_v50, 1  ;;  %v172_v52 = vperm.slane %v170_v50, 0  ;;  %v174_v55 = vperm.slane %v170_v50, 2 }
  0x14   :  { %135 = vmatpush.msra.mxu2 %v52_v27  ;;  %112 = vmatpush.msra.mxu1 %v51_v28 }
  0x15   :  { %203 = vmatpush.msra.mxu3 %v50_v29  ;;  %89 = vmatpush.msra.mxu0 %v50_v29 }
  0x16   :  { %136 = vmatpush.msra.mxu2 %v49_v30  ;;  %113 = vmatpush.msra.mxu1 %v48_v31 }
  0x17   :  { %204 = vmatpush.msra.mxu3 %v47_v32  ;;  %90 = vmatpush.msra.mxu0 %v47_v32 }
  0x18   :  { %137 = vmatpush.msra.mxu2 %v46_v33  ;;  %114 = vmatpush.msra.mxu1 %v45_v34 }
  0x19   :  { %205 = vmatpush.msra.mxu3 %v44_v35  ;;  %91 = vmatpush.msra.mxu0 %v44_v35 }
  0x1a   :  { %138 = vmatpush.msra.mxu2 %v43_v36  ;;  %115 = vmatpush.msra.mxu1 %v42_v37 }
  0x1b   :  { %206 = vmatpush.msra.mxu3 %v41_v38  ;;  %92 = vmatpush.msra.mxu0 %v41_v38 }
  0x1c   :  { %139 = vmatpush.msra.mxu2 %v40_v39  ;;  %116 = vmatpush.msra.mxu1 %v39_v40 }
  0x1d   :  { %207 = vmatpush.msra.mxu3 %v38_v41  ;;  %93 = vmatpush.msra.mxu0 %v38_v41 }
  0x1e   :  { %140 = vmatpush.msra.mxu2 %v37_v42  ;;  %117 = vmatpush.msra.mxu1 %v36_v43 }
  0x1f   :  { %208 = vmatpush.msra.mxu3 %v35_v44  ;;  %94 = vmatpush.msra.mxu0 %v35_v44 }
  0x20   :  { %141 = vmatpush.msra.mxu2 %v34_v45  ;;  %118 = vmatpush.msra.mxu1 %v33_v47 }
  0x21   :  { %142 = vmatmul.f32.vlgmr.msra.gmra.mxu2 %v30_v46  ;;  %119 = vmatmul.f32.vlgmr.msra.gmra.mxu1 %v30_v46 }
  0x22   :  { %209 = vmatpush.msra.mxu3 %v32_v48  ;;  %95 = vmatpush.msra.mxu0 %v32_v48 }
  0x23   :  { %99 = vmatmul.f32.vlgmr.msra.gmra.mxu3 %v31_v49  ;;  %96 = vmatmul.f32.vlgmr.msra.gmra.mxu0 %v30_v46 }
  0x29   :  { %145 = vmatmul.f32.gmra.mxu2 %v31_v49  ;;  %122 = vmatmul.f32.gmra.mxu1 %v31_v49 }
  0x9e   :  { %v120_v53 = vpop.f32.mrf.mxu1 }
  0x9f   :  { %v179_v54 = vadd.f32 %v173_v51, %v120_v53 }
  0xa0   :  { %v97_v56 = vpop.f32.mrf.mxu0 }
  0xa1   :  { %185 = vst [vmem:[%s404_s3 + $0x8] sm:$0xff] %v179_v54  ;;  %v178_v57 = vadd.f32 %v172_v52, %v97_v56 }
  0xa3   :  { %184 = vst [vmem:[%s404_s3] sm:$0xff] %v178_v57 }
  0xa4   :  { %v143_v58 = vpop.f32.mrf.mxu2 }
  0xa5   :  { %v180_v59 = vadd.f32 %v174_v55, %v143_v58 }
  0xa6   :  { %v100_v60 = vpop.f32.mrf.mxu3  ;;  %v123_v62 = vpop.f32.mrf.mxu1 }
  0xa7   :  { %186 = vst [vmem:[%s404_s3 + $0x10] sm:$0xff] %v180_v59  ;;  %v181_v61 = vadd.f32 %v172_v52, %v100_v60  ;;  %v182_v63 = vadd.f32 %v173_v51, %v123_v62 }
  0xa9   :  { %187 = vst [vmem:[%s404_s3 + $0x18] sm:$0xff] %v181_v61 }
  0xaa   :  { %188 = vst [vmem:[%s404_s3 + $0x20] sm:$0xff] %v182_v63 }
  0xac   :  { %v146_v0 = vpop.f32.mrf.mxu2 }
  0xad   :  { %v183_v1 = vadd.f32 %v174_v55, %v146_v0 }
  0xaf   :  { %189 = vst [vmem:[%s404_s3 + $0x28] sm:$0xff] %v183_v1 }

// kernel: _mha_fused_qkv.5
= control target key start
LH: loop header
LB: loop body
LE: loop exit
PB: predicated region body
PF: predicated region fallthrough
CT: control target
= control target key end

     0   :  { %s228_s0 = inlined_call_operand.vmem [shape: f32[16,128], index: 0, kind: input, shape index: {}]   ;;  %s229_s1 = inlined_call_operand.vmem [shape: f32[128,128], index: 1, kind: input, shape index: {}]   ;;  %s230_s2 = inlined_call_operand.vmem [shape: f32[1,128], index: 2, kind: input, shape index: {}]   ;;  %s231_s3 = inlined_call_operand.hbm [shape: f32[16,128], index: 3, kind: output, shape index: {}]  }
   0x1   :  { %v40_v0 = vld [vmem:[%s229_s1 + $0x78] sm:$0xff]  ;;  %v39_v1 = vld [vmem:[%s229_s1 + $0x70] sm:$0xff]  ;;  %v38_v2 = vld [vmem:[%s229_s1 + $0x68] sm:$0xff] }
   0x2   :  { %41 = vmatpush.msra.mxu0 %v40_v0  ;;  %99 = vmatpush.msra.mxu1 %v40_v0  ;;  %v37_v3 = vld [vmem:[%s229_s1 + $0x60] sm:$0xff]  ;;  %v36_v4 = vld [vmem:[%s229_s1 + $0x58] sm:$0xff] }
   0x4   :  { %42 = vmatpush.msra.mxu0 %v39_v1  ;;  %100 = vmatpush.msra.mxu1 %v39_v1 }
   0x6   :  { %43 = vmatpush.msra.mxu0 %v38_v2  ;;  %101 = vmatpush.msra.mxu1 %v38_v2 }
   0x7   :  { %8 = vsyncpa [#allocation4], 0  ;;  %v35_v5 = vld [vmem:[%s229_s1 + $0x50] sm:$0xff]  ;;  %v34_v6 = vld [vmem:[%s229_s1 + $0x48] sm:$0xff]  ;;  %s145_s23 = smov [#allocation3]   ;;  %s87_s26 = sshll.u32 %s231_s3, 4  ;;  %s88_s26 = int_to_ptr.hbm [resolvable:$true] %s87_s26 }
   0x8   :  { %44 = vmatpush.msra.mxu0 %v37_v3  ;;  %102 = vmatpush.msra.mxu1 %v37_v3  ;;  %v33_v7 = vld [vmem:[%s229_s1 + $0x40] sm:$0xff]  ;;  %v32_v8 = vld [vmem:[%s229_s1 + $0x38] sm:$0xff]  ;;  %v31_v9 = vld [vmem:[%s229_s1 + $0x30] sm:$0xff]  ;;  %s147_s27 = smov 8  }
   0x9   :  { %v30_v10 = vld [vmem:[%s229_s1 + $0x28] sm:$0xff]  ;;  %v29_v11 = vld [vmem:[%s229_s1 + $0x20] sm:$0xff]  ;;  %v28_v12 = vld [vmem:[%s229_s1 + $0x18] sm:$0xff] }
   0xa   :  { %45 = vmatpush.msra.mxu0 %v36_v4  ;;  %103 = vmatpush.msra.mxu1 %v36_v4  ;;  %v27_v13 = vld [vmem:[%s229_s1 + $0x10] sm:$0xff]  ;;  %v26_v14 = vld [vmem:[%s229_s1 + $0x8] sm:$0xff]  ;;  %v25_v15 = vld [vmem:[%s229_s1] sm:$0xff]  ;;  %s85_s1 = sshll.u32 %s145_s23, 4  ;;  %s86_s1 = int_to_ptr.vmem [resolvable:$true] %s85_s1 }
   0xb   :  { %v23_v16 = vld [vmem:[%s228_s0] sm:$0xff]  ;;  %v24_v17 = vld [vmem:[%s228_s0 + $0x8] sm:$0xff]  ;;  %s146_s0 = smov 128  }
   0xc   :  { %46 = vmatpush.msra.mxu0 %v35_v5  ;;  %104 = vmatpush.msra.mxu1 %v35_v5  ;;  %v118_v18 = vld [vmem:[%s230_s2] ss:$0 sm:$0xff] }
   0xe   :  { %47 = vmatpush.msra.mxu0 %v34_v6  ;;  %105 = vmatpush.msra.mxu1 %v34_v6 }
  0x10   :  { %48 = vmatpush.msra.mxu0 %v33_v7  ;;  %106 = vmatpush.msra.mxu1 %v33_v7 }
  0x12   :  { %49 = vmatpush.msra.mxu0 %v32_v8  ;;  %107 = vmatpush.msra.mxu1 %v32_v8 }
  0x14   :  { %50 = vmatpush.msra.mxu0 %v31_v9  ;;  %108 = vmatpush.msra.mxu1 %v31_v9 }
  0x16   :  { %51 = vmatpush.msra.mxu0 %v30_v10  ;;  %109 = vmatpush.msra.mxu1 %v30_v10 }
  0x18   :  { %52 = vmatpush.msra.mxu0 %v29_v11  ;;  %110 = vmatpush.msra.mxu1 %v29_v11 }
  0x1a   :  { %53 = vmatpush.msra.mxu0 %v28_v12  ;;  %111 = vmatpush.msra.mxu1 %v28_v12 }
  0x1c   :  { %54 = vmatpush.msra.mxu0 %v27_v13  ;;  %112 = vmatpush.msra.mxu1 %v27_v13 }
  0x1e   :  { %55 = vmatpush.msra.mxu0 %v26_v14  ;;  %113 = vmatpush.msra.mxu1 %v26_v14 }
  0x20   :  { %56 = vmatpush.msra.mxu0 %v25_v15  ;;  %114 = vmatpush.msra.mxu1 %v25_v15 }
  0x21   :  { %57 = vmatmul.f32.vlgmr.msra.gmra.mxu0 %v23_v16  ;;  %60 = vmatmul.f32.vlgmr.msra.gmra.mxu1 %v24_v17 }
  0x9e   :  { %v58_v19 = vpop.f32.mrf.mxu0  ;;  %v61_v20 = vpop.f32.mrf.mxu1 }
  0x9f   :  { %v77_v21 = vadd.f32 %v118_v18, %v58_v19  ;;  %v78_v22 = vadd.f32 %v118_v18, %v61_v20 }
  0xa1   :  { %79 = vst [vmem:[#allocation3] sm:$0xff] %v77_v21 }
  0xa2   :  { %80 = vst [vmem:[#allocation3 + $0x8] sm:$0xff] %v78_v22 }
  0xa3   :  { %93 = dma.vmem_to_hbm [thread:$0]  %s86_s1, 256, %s88_s26, [#allocation4], %s146_s0, %s146_s0, %s147_s27  }
  0xa4   :  { %143 = dma.done.wait [#allocation4], 256  }
  0xa5   :  { %144 = vsyncadd [#allocation4], 4294967040 }
  0xa6   :  { %98 = vsyncpa [#allocation4], 1 }

// kernel: _mha_fused_qkv.4
= control target key start
LH: loop header
LB: loop body
LE: loop exit
PB: predicated region body
PF: predicated region fallthrough
CT: control target
= control target key end

     0   :  { %s706_s15 = smov 0   ;;  %s781_s0 = inlined_call_operand.vmem [shape: f32[2,8,384], index: 0, kind: input, shape index: {}, may-alias: {0,1,2}]   ;;  %s782_s1 = inlined_call_operand.vmem [shape: f32[2,8,384], index: 1, kind: input, shape index: {}, may-alias: {0,1,2}]   ;;  %s783_s2 = inlined_call_operand.vmem [shape: f32[2,8,384], index: 2, kind: input, shape index: {}, may-alias: {0,1,2}]   ;;  %s784_s3 = inlined_call_operand.vmem [shape: s32[1,8,8], index: 3, kind: input, shape index: {}]   ;;  %s785_s4 = inlined_call_operand.vmem [shape: f32[2,8,128], index: 4, kind: output, shape index: {}]  }
   0x1 LB: > { %s617_s16 = sadd.s32 4294967295, %s676_s15   ;;  %p621_p0 = scmp.ge.s32.totalorder %s676_s15, 1  ;;  %s676_s15 = sphi %s706_s15, %s14_s15  }
   0x2   : > { %p184_p1 = scmp.lt.s32.totalorder %s676_s15, 3 }
   0x4   : > { %p185_p2 = pnand %p621_p0, %p184_p1 }
   0x5   : > { %p221_p3 = scmp.lt.s32.totalorder (!%p185_p2), %s617_s16, 1  ;;  %s678_s24 = smov (!%p185_p2), 32  }
   0x6   : > { %188 = sbr.rel (%p185_p2) target bundleno = 806 (0x326), region = 36  ;;  %s679_s25 = smov (!%p185_p2), 96  }
   0x7   : > { %s680_s26 = smov (!%p185_p2), 64  }
   0xb   : > { %s787_s16 = smov (!%p221_p3, %s617_s16), 1  ;;  %vm248_vm0 = vcmask 261120   ;;  %v245_v5 = vld [vmem:[%s784_s3] sm:$0xff]  ;;  %vm276_vm2 = vcmask 64512   ;;  %vm523_vm3 = vcmask 523264   ;;  %vm525_vm4 = vcmask 785408  }
   0xc   : > { %s717_s17 = smul.u32 24, %s787_s16  ;;  %vm246_vm1 = vcmp.eq.s32.totalorder %v245_v5, 0  ;;  %s625_s6 = sshll.u32 %s787_s16, 3 }
   0xd   : > { %s241_s9 = scalar_lea.vmem %s785_s4, %s625_s6 }
   0xe   : > { %s573_s20 = scalar_lea.vmem %s782_s1, %s717_s17  ;;  %s225_s23 = scalar_lea.vmem %s781_s0, %s717_s17 }
   0xf   : > { %v626_v0 = vld [vmem:[%s573_s20 + $0x8] sm:$0xff]  ;;  %v242_v1 = vld [vmem:[%s225_s23] sm:$0xff]  ;;  %s577_s5 = scalar_lea.vmem %s783_s2, %s717_s17 }
  0x10   : > { %628 = vmatpush.xpose.msk.msra.mxu0 %vm248_vm0, %v626_v0  ;;  %v247_v2 = vmul.f32 0.17677669, %v242_v1  ;;  %446 = vrot.lane.b32.xlu2 %v626_v0, %s678_s24  ;;  %v627_v11 = vld [vmem:[%s577_s5 + $0x10] sm:$0xff] }
  0x11   : > { %304 = vmatpush.msra.mxu1 %v627_v11 }
  0x12   : > { %311 = vrot.lane.b32.xlu1 %v247_v2, %s679_s25 }
  0x13   : > { %629 = vmatmul.msk.f32.vlgmr.msra.gmra.mxu0 %vm248_vm0, %v247_v2 }
  0x18   : > { %378 = vrot.lane.b32.xlu2 %v247_v2, %s680_s26 }
  0x1a   : > { %380 = vrot.lane.b32.xlu1 %v626_v0, %s680_s26 }
  0x22   : > { %444 = vrot.lane.b32.xlu1 %v247_v2, %s678_s24 }
  0x6a   : > { %v447_v3 = vpop.permute.xlu2 %446 }
  0x6b   : > { %637 = vmatpush.xpose.msk.msrb.mxu0 %vm248_vm0, %v447_v3 }
  0x72   : > { %v379_v19 = vpop.permute.xlu2 %378 }
  0x84   : > { %v312_v4 = vpop.permute.xlu1 %311 }
  0x8c   : > { %v381_v6 = vpop.permute.xlu1 %380 }
  0x8d   : > { %634 = vmatpush.xpose.msk.msrb.mxu1 %vm248_vm0, %v381_v6 }
  0x90   : > { %v272_v7 = vpop.f32.mrf.mxu0 }
  0x91   : > { %v275_v8 = vsel %vm246_vm1, -1e+09, %v272_v7 }
  0x92   : > { %v277_v9 = vsel %vm276_vm2, %v275_v8, -inf }
  0x93   : > { %278 = vmax.xlane.f32.xlu0 %v277_v9 }
  0x94   : > { %v445_v10 = vpop.permute.xlu1 %444 }
  0x95   : > { %638 = vmatmul.msk.f32.vlgmr.msrb.gmra.mxu0 %vm248_vm0, %v445_v10 }
  0xa7   : > { %313 = vrot.lane.b32.xlu0 %v626_v0, %s679_s25 }
 0x106   : > { %v279_v12 = vpop.xlane.xlu0 %278 }
 0x107   : > { %v280_v13 = vsub.f32 %v275_v8, %v279_v12 }
 0x109   : > { %v281_v14 = vmul.f32 1.442695, %v280_v13 }
 0x10b   : > { %654 = vpow2.f32 %v281_v14 }
 0x111   : > { %v655_v15 = vpop.eup %654 }
 0x112   : > { %630 = vmatmul.msk.f32.vlgmr.msra.gmra.mxu1 %vm276_vm2, %v655_v15  ;;  %v469_v16 = vpop.f32.mrf.mxu0  ;;  %v283_v46 = vsel %vm276_vm2, %v655_v15, 0.0 }
 0x113   : > { %v472_v17 = vsel %vm246_vm1, -1e+09, %v469_v16 }
 0x114   : > { %v473_v18 = vsel %vm276_vm2, %v472_v17, -inf }
 0x115   : > { %474 = vmax.xlane.f32.xlu0 %v473_v18 }
 0x119   : > { %v314_v20 = vpop.permute.xlu0 %313 }
 0x11a   : > { %631 = vmatpush.xpose.msk.msra.mxu2 %vm248_vm0, %v314_v20  ;;  %635 = vmatmul.msk.f32.vlgmr.msrb.gmra.mxu1 %vm248_vm0, %v379_v19 }
 0x11d   : > { %632 = vmatmul.msk.f32.vlgmr.msra.gmra.mxu2 %vm248_vm0, %v312_v4 }
 0x129   : > { %482 = vrot.lane.b32.xlu0 %v627_v11, %s678_s24 }
 0x188   : > { %v475_v21 = vpop.xlane.xlu0 %474 }
 0x189   : > { %v476_v22 = vsub.f32 %v472_v17, %v475_v21 }
 0x18b   : > { %v477_v24 = vmul.f32 1.442695, %v476_v22 }
 0x18d   : > { %656 = vpow2.f32 %v477_v24 }
 0x18f   : > { %v754_v23 = vpop.f32.mrf.mxu1 }
 0x193   : > { %v657_v28 = vpop.eup %656 }
 0x194   : > { %v479_v33 = vsel %vm276_vm2, %v657_v28, 0.0 }
 0x197   : > { %v403_v25 = vpop.f32.mrf.mxu1 }
 0x198   : > { %v406_v26 = vsel %vm246_vm1, -1e+09, %v403_v25 }
 0x199   : > { %v407_v27 = vsel %vm276_vm2, %v406_v26, -inf }
 0x19a   : > { %408 = vmax.xlane.f32.xlu1 %v407_v27 }
 0x19b   : > { %v483_v29 = vpop.permute.xlu0 %482 }
 0x19c   : > { %503 = vmatpush.msrb.mxu2 %v483_v29 }
 0x19d   : > { %639 = vmatmul.msk.f32.vlgmr.msrb.gmra.mxu2 %vm276_vm2, %v657_v28 }
 0x1a0   : > { %v336_v30 = vpop.f32.mrf.mxu2 }
 0x1a1   : > { %v339_v31 = vsel %vm246_vm1, -1e+09, %v336_v30 }
 0x1a2   : > { %v340_v32 = vsel %vm276_vm2, %v339_v31, -inf }
 0x1a3   : > { %341 = vmax.xlane.f32.xlu2 %v340_v32 }
 0x1b3   : > { %416 = vrot.lane.b32.xlu1 %v627_v11, %s680_s26 }
 0x1bb   : > { %350 = vrot.lane.b32.xlu2 %v627_v11, %s679_s25 }
 0x1dd   : > { %480 = vadd.xlane.f32.xlu1 %v479_v33 }
 0x20d   : > { %v409_v34 = vpop.xlane.xlu1 %408 }
 0x20e   : > { %v410_v35 = vsub.f32 %v406_v26, %v409_v34 }
 0x210   : > { %v411_v36 = vmul.f32 1.442695, %v410_v35 }
 0x212   : > { %658 = vpow2.f32 %v411_v36 }
 0x216   : > { %v342_v37 = vpop.xlane.xlu2 %341 }
 0x217   : > { %v343_v38 = vsub.f32 %v339_v31, %v342_v37 }
 0x218   : > { %v659_v39 = vpop.eup %658 }
 0x219   : > { %v344_v40 = vmul.f32 1.442695, %v343_v38  ;;  %v413_v41 = vsel %vm276_vm2, %v659_v39, 0.0 }
 0x21a   : > { %414 = vadd.xlane.f32.xlu0 %v413_v41 }
 0x21b   : > { %660 = vpow2.f32 %v344_v40 }
 0x21e   : > { %v351_v42 = vpop.permute.xlu2 %350 }
 0x21f   : > { %371 = vmatpush.msra.mxu3 %v351_v42 }
 0x220   : > { %v505_v49 = vpop.f32.mrf.mxu2 }
 0x221   : > { %v661_v43 = vpop.eup %660 }
 0x222   : > { %633 = vmatmul.msk.f32.vlgmr.msra.gmra.mxu3 %vm276_vm2, %v661_v43  ;;  %v346_v44 = vsel %vm276_vm2, %v661_v43, 0.0 }
 0x223   : > { %347 = vadd.xlane.f32.xlu2 %v346_v44 }
 0x225   : > { %v417_v45 = vpop.permute.xlu1 %416 }
 0x226   : > { %437 = vmatpush.msrb.mxu3 %v417_v45 }
 0x22a   : > { %636 = vmatmul.msk.f32.vlgmr.msrb.gmra.mxu3 %vm276_vm2, %v659_v39 }
 0x22b   : > { %284 = vadd.xlane.f32.xlu2 %v283_v46 }
 0x250   : > { %v481_v47 = vpop.xlane.xlu1 %480 }
 0x251   : > { %662 = vrcp.f32 %v481_v47 }
 0x257   : > { %v663_v48 = vpop.eup %662 }
 0x258   : > { %v509_v50 = vmul.f32 %v663_v48, %v505_v49 }
 0x25a   : > { %519 = vrot.lane.b32.xlu1 %v509_v50, %s679_s25 }
 0x28d   : > { %v415_v52 = vpop.xlane.xlu0 %414 }
 0x296   : > { %v348_v51 = vpop.xlane.xlu2 %347 }
 0x297   : > { %664 = vrcp.f32 %v348_v51 }
 0x298   : > { %666 = vrcp.f32 %v415_v52 }
 0x29d   : > { %v665_v53 = vpop.eup %664 }
 0x29e   : > { %v667_v56 = vpop.eup %666  ;;  %v285_v59 = vpop.xlane.xlu2 %284 }
 0x29f   : > { %668 = vrcp.f32 %v285_v59 }
 0x2a5   : > { %v373_v54 = vpop.f32.mrf.mxu3  ;;  %v669_v60 = vpop.eup %668 }
 0x2a6   : > { %v377_v55 = vmul.f32 %v665_v53, %v373_v54  ;;  %v310_v62 = vmul.f32 %v669_v60, %v754_v23 }
 0x2a8   : > { %511 = vrot.lane.b32.xlu2 %v377_v55, %s678_s24 }
 0x2ad   : > { %v439_v57 = vpop.f32.mrf.mxu3 }
 0x2ae   : > { %v443_v58 = vmul.f32 %v667_v56, %v439_v57 }
 0x2b0   : > { %515 = vrot.lane.b32.xlu0 %v443_v58, %s680_s26 }
 0x2cc   : > { %v520_v1 = vpop.permute.xlu1 %519 }
 0x302   : > { %v512_v61 = vpop.permute.xlu2 %511 }
 0x303   : > { %v522_v63 = vsel %vm248_vm0, %v310_v62, %v512_v61 }
 0x322   : > { %v516_v0 = vpop.permute.xlu0 %515 }
 0x323   : > { %v524_v2 = vsel %vm523_vm3, %v522_v63, %v516_v0 }
 0x324   : > { %v526_v3 = vsel %vm525_vm4, %v524_v2, %v520_v1 }
 0x325   : > { %527 = vst [vmem:[%s241_s9] sm:$0xff] %v526_v3 }
 0x326 PF: > { %s14_s15 = sadd.s32 1, %s676_s15  }
 0x327   : > { %p11_p4 = scmp.ge.s32.totalorder %s14_s15, 4  }
 0x329   :  { %13 = sbr.rel (!%p11_p4) target bundleno = 1 (0x1), region = 72 }

</bundles_post_ra>
